<compile_context>
chip_gen: v6e
topology: v6e:2x2x1
jax: 0.10.0
libtpu: 0.0.40
codegen_flags: <defaults>
</compile_context>

<pallas_src>
import jax
import jax.numpy as jnp
from jax.experimental import pallas as pl
from jax.experimental.pallas import tpu as pltpu


def _round_up(n, m):
    return (n + m - 1) // m * m


def _patch_embed_kernel(x_ref, w_ref, pos_ref, o_ref):
    # x_ref:   (TM, Kp)  bf16   flattened patches for one (token-tile, batch) step
    # w_ref:   (Kp, Hp)  bf16   fused conv+linear projection weight (resident)
    # pos_ref: (TM, Hp)  bf16   positional-embedding rows (+ fused biases)
    # o_ref:   (TM, Hp)  out dtype
    h = jnp.dot(x_ref[...], w_ref[...], preferred_element_type=jnp.float32)  # single MXU GEMM
    o_ref[...] = (h + pos_ref[...].astype(jnp.float32)).astype(o_ref.dtype)


def fuse_patch_embed_params(conv_w, conv_b, lin_w, lin_b, pos_table, max_image_tokens):
    """Fold Conv2d-as-matmul + Linear into one (K, hidden) weight and fold both biases
    into the positional table.  Contains an extra hidden x hidden x K f32 GEMM -- call
    ONCE at init (or let it constant-fold under jit with static weights)."""
    hidden = conv_w.shape[0]
    K = conv_w.shape[1] * conv_w.shape[2] * conv_w.shape[3]
    hi = jax.lax.Precision.HIGHEST
    wc = conv_w.reshape(hidden, K).T.astype(jnp.float32)              # (K, hidden)
    wl_t = lin_w.T.astype(jnp.float32)                                # torch Linear: y = x @ W^T + b
    w_fused = jnp.dot(wc, wl_t, precision=hi)                         # (K, hidden) f32
    b_fused = jnp.dot(conv_b.astype(jnp.float32), wl_t, precision=hi) + lin_b
    # NOTE: bf16-casting the fused weight downstream folds two GEMMs' rounding into one
    # quantization; validate on production-scale weights (keep f32 if accuracy regresses).
    pos_eff = pos_table[:max_image_tokens].astype(jnp.float32) + b_fused[None, :]
    return w_fused, pos_eff


def patch_embeddings(pixel_values, w_fused, pos_eff, patch_size, max_image_tokens,
                     out_dtype=jnp.float32):
    """pixel_values: (B, C, H, W) f32.  w_fused/pos_eff from fuse_patch_embed_params.
    Returns (B, max_image_tokens, hidden) in out_dtype."""
    B, C, H, W = pixel_values.shape
    ph, pw = patch_size
    gh, gw = H // ph, W // pw
    num_patches = gh * gw
    K, hidden = w_fused.shape
    assert K == C * ph * pw, (K, C, ph, pw)

    # The torch module adds the full pos table after slicing to max_image_tokens, i.e. it
    # intentionally TRUNCATES trailing patches; mirror that and fail loudly otherwise.
    assert num_patches >= max_image_tokens, (num_patches, max_image_tokens)
    P = max_image_tokens

    # ---- lane-dense padding (K and hidden up to multiples of 128) ----------
    Kp = _round_up(K, 128)
    Hp = _round_up(hidden, 128)
    out_bytes = jnp.dtype(out_dtype).itemsize

    # ---- token-tile size ----------------------------------------------------
    # Largest multiple of 16 (bf16 sublane packing) that divides P, so Pp == P and the
    # trailing slice is a no-op; capped so the pipelined VMEM footprint stays modest.
    def footprint(tm, w_bufs=2):
        return (2 * tm * Kp * 2            # x   (bf16, double-buffered)
                + w_bufs * Kp * Hp * 2     # fused weight (bf16)
                + 2 * tm * Hp * 2          # pos (bf16, double-buffered)
                + 2 * tm * Hp * out_bytes)  # output (double-buffered)

    cap = 512
    while cap > 128 and footprint(cap) > (24 << 20):
        cap //= 2
    cap = max(16, min(cap, _round_up(P, 16)))
    TM = None
    t = 16
    while t <= cap:
        if P % t == 0:
            TM = t
        t += 16
    if TM is None:                      # P not a multiple of 16 -> pad the token axis
        TM = min(cap, _round_up(P, 16))
    nt = -(-P // TM)
    Pp = nt * TM

    # ---- patch extraction: drop unused patch rows BEFORE the relayout ------
    # (B, C, gh, ph, gw, pw) -> keep rows -> (B, gh_keep, gw, C, ph, pw) -> (B, P, K)
    # TODO(synk): a fully in-kernel patchify (manual DMA of NCHW row strips + in-VMEM
    # transpose) could save one HBM pass over the image; left to XLA input fusion.
    gh_keep = -(-P // gw)
    x = pixel_values.reshape(B, C, gh, ph, gw, pw)[:, :, :gh_keep]
    x = x.transpose(0, 2, 4, 1, 3, 5).reshape(B, gh_keep * gw, K)[:, :P]
    x = jnp.pad(x, ((0, 0), (0, Pp - P), (0, Kp - K))).astype(jnp.bfloat16)

    # ---- pad/cast fused params (cheap; constant-folds under jit) -----------
    w_p = jnp.pad(w_fused, ((0, Kp - K), (0, Hp - hidden))).astype(jnp.bfloat16)
    pos_p = jnp.pad(pos_eff, ((0, Pp - P), (0, Hp - hidden))).astype(jnp.bfloat16)

    # ---- grid ordering ------------------------------------------------------
    # Token-tile outer: pos/weight block indices are constant across the inner batch
    # loop, so Pallas skips their re-fetch.  With nt == 1, put batch first so the
    # leading parallel axis has >= 2 steps (v7x megacore).
    if nt >= 2:
        grid = (nt, B)
        x_map = lambda t_, b: (b, t_, 0)
        w_map = lambda t_, b: (0, 0)
        pos_map = lambda t_, b: (t_, 0)
        out_map = lambda t_, b: (b, t_, 0)
    else:
        grid = (B, nt)
        x_map = lambda b, t_: (b, t_, 0)
        w_map = lambda b, t_: (0, 0)
        pos_map = lambda b, t_: (t_, 0)
        out_map = lambda b, t_: (b, t_, 0)

    vmem_limit = int(min(max(2 * footprint(TM), 32 << 20), 60 << 20))

    def build(single_buffer_weight):
        if single_buffer_weight:
            # Constant index map -> second pipeline buffer is pure waste; single-buffer
            # the resident weight to reclaim Kp*Hp*2 bytes of VMEM.
            w_spec = pl.BlockSpec((Kp, Hp), w_map, pipeline_mode=pl.Buffered(1))
        else:
            w_spec = pl.BlockSpec((Kp, Hp), w_map)
        grid_spec = pltpu.PrefetchScalarGridSpec(
            num_scalar_prefetch=0,
            grid=grid,
            in_specs=[
                pl.BlockSpec((None, TM, Kp), x_map),   # x, batch dim squeezed
                w_spec,                                # fused weight (resident)
                pl.BlockSpec((TM, Hp), pos_map),       # pos (+ fused biases), bf16
            ],
            out_specs=pl.BlockSpec((None, TM, Hp), out_map),
        )
        return pl.pallas_call(
            _patch_embed_kernel,
            out_shape=jax.ShapeDtypeStruct((B, Pp, Hp), out_dtype),
            grid_spec=grid_spec,
            compiler_params=pltpu.CompilerParams(
                dimension_semantics=("parallel", "parallel"),
                vmem_limit_bytes=vmem_limit,
                # TODO(synk): verify in the HLO that the patchify reshape/transpose/pad
                # actually fuses into the x operand; if Mosaic bails it is staged as a
                # bf16 array in HBM (still half the bytes of an f32 staging pass).
                allow_input_fusion=[True, False, False],
            ),
        )

    try:
        out = build(True)(x, w_p, pos_p)
    except Exception:
        # pipeline_mode not accepted by this runtime -> default double-buffered weight.
        out = build(False)(x, w_p, pos_p)

    if Pp == P and Hp == hidden:
        return out                      # no padding -> no extra HBM pass
    return out[:, :P, :hidden]


def _reference(pixel_values, conv_w, conv_b, lin_w, lin_b, pos_table,
               patch_size, max_image_tokens):
    """Pure-JAX reference mirroring the PyTorch forward exactly (two GEMMs, f32)."""
    ph, pw = patch_size
    emb = jax.lax.conv_general_dilated(
        pixel_values, conv_w, window_strides=(ph, pw), padding="VALID",
        dimension_numbers=("NCHW", "OIHW", "NCHW"))               # (B, hidden, gh, gw)
    emb = emb + conv_b[None, :, None, None]
    B, Hd, gh, gw = emb.shape
    emb = emb.reshape(B, Hd, gh * gw).transpose(0, 2, 1)          # flatten(2).transpose(1,2)
    emb = emb @ lin_w.T + lin_b
    emb = emb[:, :max_image_tokens, :]
    return emb + pos_table[None, :max_image_tokens, :]


if __name__ == "__main__":
    # Small config: image 16x16, patch 4x4 -> 16 patches; hidden 128 (lane-aligned).
    B, C, IMG, PATCH, HIDDEN = 2, 4, 16, 4, 128
    MAX_TOKENS = (IMG // PATCH) * (IMG // PATCH)   # 16 == num_patches

    key = jax.random.PRNGKey(0)
    k_x, k_cw, k_cb, k_lw, k_lb, k_pe = jax.random.split(key, 6)

    pixel_values = jax.random.normal(k_x, (B, C, IMG, IMG), dtype=jnp.float32)
    conv_w = jax.random.normal(k_cw, (HIDDEN, C, PATCH, PATCH), dtype=jnp.float32) * 0.05
    conv_b = jax.random.normal(k_cb, (HIDDEN,), dtype=jnp.float32) * 0.05
    lin_w = jax.random.normal(k_lw, (HIDDEN, HIDDEN), dtype=jnp.float32) * 0.05
    lin_b = jax.random.normal(k_lb, (HIDDEN,), dtype=jnp.float32) * 0.05
    pos_table = jax.random.normal(k_pe, (MAX_TOKENS, HIDDEN), dtype=jnp.float32) * 0.05

    # One-time parameter fusion (init-time work, hoisted out of the forward path).
    w_fused, pos_eff = fuse_patch_embed_params(conv_w, conv_b, lin_w, lin_b,
                                               pos_table, MAX_TOKENS)

    out = patch_embeddings(pixel_values, w_fused, pos_eff, (PATCH, PATCH), MAX_TOKENS)
    out = jax.block_until_ready(out)

    ref = _reference(pixel_values, conv_w, conv_b, lin_w, lin_b, pos_table,
                     (PATCH, PATCH), MAX_TOKENS)
    assert out.shape == (B, MAX_TOKENS, HIDDEN), out.shape
    # bf16 MXU inputs + bf16 pos stream + algebraic GEMM fusion change rounding slightly.
    max_err = float(jnp.abs(out - ref).max())
    assert jnp.allclose(out, ref, atol=2e-2, rtol=2e-2), max_err

    print("KERNEL_OK")
</pallas_src>

<mosaic_0001>
module attributes {stable_mosaic.version = 11 : i64} {
  func.func @_patch_embed_kernel(%arg0: i32, %arg1: i32, %arg2: memref<1x16x128xbf16, #tpu.memory_space<vmem>>, %arg3: memref<128x128xbf16, #tpu.memory_space<vmem>>, %arg4: memref<16x128xbf16, #tpu.memory_space<vmem>>, %arg5: memref<1x16x128xf32, #tpu.memory_space<vmem>>) attributes {dimension_semantics = [#tpu.dimension_semantics<parallel>, #tpu.dimension_semantics<parallel>], iteration_bounds = array<i64: 2, 1>, scalar_prefetch = 0 : i64, scratch_operands = 0 : i64, tpu.core_type = #tpu.core_type<tc>, window_params = [{transform_indices = @transform_0, window_bounds = array<i64: 1, 16, 128>}, {pipeline_mode = #tpu.pipeline_mode<synchronous>, transform_indices = @transform_1, window_bounds = array<i64: 128, 128>}, {transform_indices = @transform_2, window_bounds = array<i64: 16, 128>}, {transform_indices = @transform_3, window_bounds = array<i64: 1, 16, 128>}]} {
    %c0 = arith.constant 0 : index
    %c0_0 = arith.constant 0 : index
    %c0_1 = arith.constant 0 : index
    %0 = vector.load %arg2[%c0, %c0_0, %c0_1] : memref<1x16x128xbf16, #tpu.memory_space<vmem>>, vector<1x16x128xbf16>
    %1 = vector.shape_cast %0 : vector<1x16x128xbf16> to vector<16x128xbf16>
    %c0_2 = arith.constant 0 : index
    %c0_3 = arith.constant 0 : index
    %2 = vector.load %arg3[%c0_2, %c0_3] : memref<128x128xbf16, #tpu.memory_space<vmem>>, vector<128x128xbf16>
    %cst = arith.constant dense<0.000000e+00> : vector<16x128xf32>
    %3 = tpu.matmul %1, %2, %cst {dimension_numbers = #tpu.dot_dimension_numbers<[1], [0], [0], [1], [0, 0, 1, 1], [], []>} : vector<16x128xbf16>, vector<128x128xbf16>, vector<16x128xf32> -> vector<16x128xf32>
    %c0_4 = arith.constant 0 : index
    %c0_5 = arith.constant 0 : index
    %4 = vector.load %arg4[%c0_4, %c0_5] : memref<16x128xbf16, #tpu.memory_space<vmem>>, vector<16x128xbf16>
    %5 = arith.extf %4 : vector<16x128xbf16> to vector<16x128xf32>
    %6 = arith.addf %3, %5 : vector<16x128xf32>
    %c0_6 = arith.constant 0 : index
    %c0_7 = arith.constant 0 : index
    %c0_8 = arith.constant 0 : index
    %7 = vector.load %arg5[%c0_6, %c0_7, %c0_8] : memref<1x16x128xf32, #tpu.memory_space<vmem>>, vector<1x16x128xf32>
    %8 = vector.shape_cast %7 : vector<1x16x128xf32> to vector<16x128xf32>
    %9 = vector.shape_cast %6 : vector<16x128xf32> to vector<1x16x128xf32>
    tpu.vector_store %arg5[%c0_6, %c0_7, %c0_8], %9 {strides = array<i32>} : memref<1x16x128xf32, #tpu.memory_space<vmem>>, vector<1x16x128xf32>,
    return
  }
  func.func @transform_0(%arg0: i32, %arg1: i32) -> (i32, i32, i32) {
    %c0_i32 = arith.constant 0 : i32
    %c0_i32_0 = arith.constant 0 : i32
    return %arg0, %arg1, %c0_i32 : i32, i32, i32
  }
  func.func @transform_1(%arg0: i32, %arg1: i32) -> (i32, i32) {
    %c0_i32 = arith.constant 0 : i32
    %c0_i32_0 = arith.constant 0 : i32
    %c0_i32_1 = arith.constant 0 : i32
    return %c0_i32, %c0_i32_0 : i32, i32
  }
  func.func @transform_2(%arg0: i32, %arg1: i32) -> (i32, i32) {
    %c0_i32 = arith.constant 0 : i32
    %c0_i32_0 = arith.constant 0 : i32
    return %arg1, %c0_i32 : i32, i32
  }
  func.func @transform_3(%arg0: i32, %arg1: i32) -> (i32, i32, i32) {
    %c0_i32 = arith.constant 0 : i32
    %c0_i32_0 = arith.constant 0 : i32
    return %arg0, %arg1, %c0_i32 : i32, i32, i32
  }
}

module attributes {stable_mosaic.version = 11 : i64} {
  func.func @_patch_embed_kernel(%arg0: i32, %arg1: i32, %arg2: memref<1x16x128xbf16, #tpu.memory_space<vmem>>, %arg3: memref<128x128xbf16, #tpu.memory_space<vmem>>, %arg4: memref<16x128xbf16, #tpu.memory_space<vmem>>, %arg5: memref<1x16x128xf32, #tpu.memory_space<vmem>>) attributes {dimension_semantics = [#tpu.dimension_semantics<parallel>, #tpu.dimension_semantics<parallel>], iteration_bounds = array<i64: 2, 1>, scalar_prefetch = 0 : i64, scratch_operands = 0 : i64, tpu.core_type = #tpu.core_type<tc>, window_params = [{transform_indices = @transform_0, window_bounds = array<i64: 1, 16, 128>}, {pipeline_mode = #tpu.pipeline_mode<synchronous>, transform_indices = @transform_1, window_bounds = array<i64: 128, 128>}, {transform_indices = @transform_2, window_bounds = array<i64: 16, 128>}, {transform_indices = @transform_3, window_bounds = array<i64: 1, 16, 128>}]} {
    %c0 = arith.constant 0 : index
    %c0_0 = arith.constant 0 : index
    %c0_1 = arith.constant 0 : index
    %0 = vector.load %arg2[%c0, %c0_0, %c0_1] : memref<1x16x128xbf16, #tpu.memory_space<vmem>>, vector<1x16x128xbf16>
    %1 = vector.shape_cast %0 : vector<1x16x128xbf16> to vector<16x128xbf16>
    %c0_2 = arith.constant 0 : index
    %c0_3 = arith.constant 0 : index
    %2 = vector.load %arg3[%c0_2, %c0_3] : memref<128x128xbf16, #tpu.memory_space<vmem>>, vector<128x128xbf16>
    %cst = arith.constant dense<0.000000e+00> : vector<16x128xf32>
    %3 = tpu.matmul %1, %2, %cst {dimension_numbers = #tpu.dot_dimension_numbers<[1], [0], [0], [1], [0, 0, 1, 1], [], []>} : vector<16x128xbf16>, vector<128x128xbf16>, vector<16x128xf32> -> vector<16x128xf32>
    %c0_4 = arith.constant 0 : index
    %c0_5 = arith.constant 0 : index
    %4 = vector.load %arg4[%c0_4, %c0_5] : memref<16x128xbf16, #tpu.memory_space<vmem>>, vector<16x128xbf16>
    %5 = arith.extf %4 : vector<16x128xbf16> to vector<16x128xf32>
    %6 = arith.addf %3, %5 : vector<16x128xf32>
    %c0_6 = arith.constant 0 : index
    %c0_7 = arith.constant 0 : index
    %c0_8 = arith.constant 0 : index
    %7 = vector.load %arg5[%c0_6, %c0_7, %c0_8] : memref<1x16x128xf32, #tpu.memory_space<vmem>>, vector<1x16x128xf32>
    %8 = vector.shape_cast %7 : vector<1x16x128xf32> to vector<16x128xf32>
    %9 = vector.shape_cast %6 : vector<16x128xf32> to vector<1x16x128xf32>
    tpu.vector_store %arg5[%c0_6, %c0_7, %c0_8], %9 {strides = array<i32>} : memref<1x16x128xf32, #tpu.memory_space<vmem>>, vector<1x16x128xf32>,
    return
  }
  func.func @transform_0(%arg0: i32, %arg1: i32) -> (i32, i32, i32) {
    %c0_i32 = arith.constant 0 : i32
    %c0_i32_0 = arith.constant 0 : i32
    return %arg0, %arg1, %c0_i32 : i32, i32, i32
  }
  func.func @transform_1(%arg0: i32, %arg1: i32) -> (i32, i32) {
    %c0_i32 = arith.constant 0 : i32
    %c0_i32_0 = arith.constant 0 : i32
    %c0_i32_1 = arith.constant 0 : i32
    return %c0_i32, %c0_i32_0 : i32, i32
  }
  func.func @transform_2(%arg0: i32, %arg1: i32) -> (i32, i32) {
    %c0_i32 = arith.constant 0 : i32
    %c0_i32_0 = arith.constant 0 : i32
    return %arg1, %c0_i32 : i32, i32
  }
  func.func @transform_3(%arg0: i32, %arg1: i32) -> (i32, i32, i32) {
    %c0_i32 = arith.constant 0 : i32
    %c0_i32_0 = arith.constant 0 : i32
    return %arg0, %arg1, %c0_i32 : i32, i32, i32
  }
}

</mosaic_0001>

<bundles_post_ra>
// kernel: tpu_custom_call.1
= control target key start
LH: loop header
LB: loop body
LE: loop exit
PB: predicated region body
PF: predicated region fallthrough
CT: control target
= control target key end

     0   :  { %8 = vsyncpa [#allocation3], 0  ;;  %s1049_s0 = inlined_call_operand.hbm [shape: bf16[2,16,128], index: 0, kind: input, shape index: {}]   ;;  %s1050_s1 = inlined_call_operand.hbm [shape: bf16[128,128], index: 1, kind: input, shape index: {}]   ;;  %s1051_s2 = inlined_call_operand.hbm [shape: bf16[16,128], index: 2, kind: input, shape index: {}]   ;;  %s1052_s3 = inlined_call_operand.hbm [shape: f32[2,16,128], index: 3, kind: output, shape index: {}]  }
   0x1   :  { %10 = vsyncpa [#allocation3 + $0x1], 0 }
   0x2   :  { %11 = vsyncpa [#allocation6], 0 }
   0x3   :  { %12 = vsyncpa [#allocation4], 0 }
   0x4   :  { %14 = vsyncpa [#allocation4 + $0x1], 0  ;;  %s848_s12 = smov 0   ;;  %s850_s13 = smov 0  }
   0x5   :  { %s852_s14 = smov 0   ;;  %s854_s15 = smov 0  }
   0x6   :  { %s856_s16 = smov 0   ;;  %s858_s17 = smov 0  }
   0x7 LB: > { %s491_s18 = sadd.s32 4294967295, %s816_s17   ;;  %s492_s19 = sadd.s32 4294967294, %s816_s17   ;;  %s816_s17 = sphi %s858_s17, %s20_s17   ;;  %s812_s16 = sphi %s856_s16, %s1069_s16   ;;  %s808_s15 = sphi %s854_s15, %s1068_s15   ;;  %s804_s14 = sphi %s852_s14, %s1067_s14   ;;  %s800_s13 = sphi %s850_s13, %s1066_s13   ;;  %s796_s12 = sphi %s848_s12, %s1065_s12  }
   0x8   : > { %p54_p0 = scmp.ne.s32.totalorder %s800_s13, %s796_s12  ;;  %p882_p1 = scmp.eq.s32.totalorder %s491_s18, 0 }
   0x9   : > { %p886_p2 = scmp.eq.s32.totalorder %s491_s18, 1  ;;  %p133_p3 = scmp.eq.s32.totalorder %s492_s19, 1 }
   0xa   : > { %p892_p4 = por %p882_p1, %p54_p0  ;;  %p493_p5 = scmp.ge.s32.totalorder %s816_s17, 1 }
   0xb   : > { %p897_p6 = por %p133_p3, %p54_p0  ;;  %p140_p7 = scmp.lt.s32.totalorder %s816_s17, 3 }
   0xc   : > { %s818_s25 = smov [#allocation5]   ;;  %s819_s28 = smov [#allocation7]  }
   0xd   : > { %s1057_s23 = scalar_select %p897_p6, 1, 0 }
   0xe   : > { %p902_p8 = pnand %p493_p5, %p140_p7  ;;  %s152_s26 = sshll.u32 %s818_s25, 4  ;;  %s153_s26 = int_to_ptr.vmem [resolvable:$true] %s152_s26 }
   0xf   : > { %s168_s29 = sshll.u32 %s819_s28, 4  ;;  %s663_s30 = scalar_lea.vmem %s153_s26, 1024  ;;  %s169_s29 = int_to_ptr.vmem [resolvable:$true] %s168_s29 }
  0x10   : > { %p566_p9 = pneg %p902_p8  ;;  %p664_p13 = scmp.ne.s32.totalorder %s153_s26, %s663_s30 }
  0x11   : > { %p671_p5 = scmp.lt.s32.totalorder %s153_s26, %s153_s26  ;;  %p672_p7 = scmp.lt.s32.totalorder %s663_s30, %s663_s30 }
  0x12   : > { %p911_p11 = pnand %p566_p9, %p882_p1 }
  0x13   : > { %p673_p10 = por %p672_p7, %p671_p5 }
  0x14   : > { %p654_p12 = pneg %p911_p11 }
  0x16   : > { %p666_p0 = pnand %p664_p13, %p654_p12 }
  0x18   : > { %p667_p3 = pneg %p666_p0 }
  0x1a   : > { %p674_p9 = pnand %p673_p10, %p667_p3 }
  0x1c   : > { %677 = shalt.err (!%p674_p9)
}
  0x1d   : > { %s1053_s4 = smov 64   ;;  %s821_s5 = smov 4  }
  0x1e   : > { %569 = dma.hbm_to_vmem [thread:$0]  (!%p911_p11), %s1050_s1, 1024, %s153_s26, [#allocation6], %s1053_s4, %s1053_s4, %s821_s5  }
  0x1f   : > { %s689_s8 = scalar_lea.vmem %s169_s29, 128  ;;  %p697_p10 = scmp.lt.s32.totalorder %s169_s29, %s169_s29 }
  0x20   : > { %p690_p13 = scmp.ne.s32.totalorder %s169_s29, %s689_s8  ;;  %p698_p3 = scmp.lt.s32.totalorder %s689_s8, %s689_s8 }
  0x22   : > { %p692_p0 = pnand %p690_p13, %p654_p12  ;;  %p699_p7 = por %p698_p3, %p697_p10 }
  0x24   : > { %p693_p5 = pneg %p692_p0 }
  0x26   : > { %p700_p9 = pnand %p699_p7, %p693_p5 }
  0x28   : > { %703 = shalt.err (!%p700_p9)
}
  0x29   : > { %572 = dma.hbm_to_vmem [thread:$0]  (!%p911_p11), %s1051_s2, 128, %s169_s29, [#allocation6], %s1053_s4, %s1053_s4, %s821_s5  }
  0x2a   : > { %s32_s11 = sadd.s32 1, %s812_s16  ;;  %s41_s18 = sadd.s32 1, %s804_s14 }
  0x2b   : > { %p34_p12 = scmp.ge.s32.totalorder %s32_s11, 2  ;;  %p48_p13 = scmp.ne.s32.totalorder %s804_s14, %s800_s13 }
  0x2c   : > { %p49_p0 = scmp.eq.s32.totalorder %s816_s17, 0  ;;  %p583_p5 = scmp.lt.s32.totalorder %s816_s17, 2 }
  0x2d   : > { %s1071_s11 = smov (%p34_p12, %s32_s11), 0  ;;  %p949_p3 = por %p886_p2, %p48_p13 }
  0x2e   : > { %p50_p10 = por %p49_p0, %p48_p13  ;;  %s36_s25 = ssub.s32 %s812_s16, %s1071_s11 }
  0x2f   : > { %s182_s26 = sand.u32 1, %s804_s14   ;;  %p39_p7 = scmp.eq.s32.totalorder %s36_s25, 0 }
  0x30   : > { %s497_s27 = sshll.u32 %s182_s26, 3  ;;  %s519_s28 = sshll.u32 %s812_s16, 7 }
  0x31   : > { %s958_s29 = scalar_select %p39_p7, %s804_s14, %s41_s18  }
  0x32   : > { %s194_s7 = scalar_lea.hbm %s1049_s0, %s519_s28  ;;  %s186_s8 = scalar_lea.vmem [#allocation2], %s497_s27 }
  0x33   : > { %s195_s9 = sshll.u32 %s186_s8, 4  ;;  %p965_p11 = pnand %p583_p5, %p50_p10  ;;  %s196_s9 = int_to_ptr.vmem [resolvable:$true] %s195_s9 }
  0x34   : > { %s183_s10 = scalar_lea.sflag [#allocation3], %s182_s26  ;;  %s717_s25 = scalar_lea.vmem %s196_s9, 128 }
  0x35   : > { %p706_p2 = pneg %p965_p11  ;;  %p718_p9 = scmp.ne.s32.totalorder %s196_s9, %s717_s25 }
  0x36   : > { %s822_s18 = smov [#allocation2]  }
  0x37   : > { %p720_p12 = pnand %p718_p9, %p706_p2  ;;  %s722_s4 = sshll.u32 %s822_s18, 4  ;;  %s723_s4 = int_to_ptr.vmem [resolvable:$false] %s722_s4 }
  0x38   : > { %s724_s28 = scalar_lea.vmem %s723_s4, 256  ;;  %p725_p0 = scmp.lt.s32.totalorder %s196_s9, %s723_s4 }
  0x39   : > { %p721_p13 = pneg %p720_p12  ;;  %p726_p7 = scmp.lt.s32.totalorder %s724_s28, %s717_s25 }
  0x3b   : > { %p727_p6 = por %p726_p7, %p725_p0 }
  0x3d   : > { %p728_p5 = pnand %p727_p6, %p721_p13 }
  0x3f   : > { %731 = shalt.err (!%p728_p5)
}
  0x40   : > { %s1062_s27 = smov 64   ;;  %207 = sbr.rel (%p902_p8) target bundleno = 318 (0x13e), region = 32 }
  0x41   : > { %576 = dma.hbm_to_vmem [thread:$0]  (!%p965_p11), %s194_s7, 128, %s196_s9, %s183_s10, %s1062_s27, %s1062_s27, %s821_s5  }
  0x42   : > { %s979_s26 = sand.u32 (!%p902_p8), 1, %s800_s13  }
  0x43   : > { %s501_s4 = sshll.u32 (!%p902_p8), %s979_s26, 3  ;;  %s210_s30 = scalar_lea.sflag (!%p902_p8), [#allocation3], %s979_s26 }
  0x44   : > { %s983_s6 = scalar_lea.vmem (!%p902_p8), [#allocation2], %s501_s4 }
  0x45   : > { %783 = dma.done.wait (%p892_p4), %s210_s30, 128  }
  0x46   : > { %785 = vsyncadd (%p892_p4), %s210_s30, 4294967168 }
  0x47   : > { %787 = dma.done.wait (%p882_p1), [#allocation6], 1152  }
  0x48   : > { %789 = vsyncadd (%p882_p1), [#allocation6], 4294966144  ;;  %v823_v0 = vmov 0.0   ;;  %vm824_vm0 = vmmov 0   ;;  %v643_v1 = vld [vmem:[#allocation5 + $0x38] sm:$0xff]   ;;  %v644_v2 = vld [vmem:[#allocation5 + $0x30] sm:$0xff]  }
  0x49   : > { %534 = vmatprep.subr.bf16.mxu0 %v823_v0  ;;  %550 = vmatprep.mubr.msk.bf16.mxu0 %vm824_vm0, %v823_v0  ;;  %v645_v3 = vld [vmem:[#allocation5 + $0x28] sm:$0xff]   ;;  %v646_v4 = vld [vmem:[#allocation5 + $0x20] sm:$0xff]   ;;  %v647_v5 = vld [vmem:[#allocation5 + $0x18] sm:$0xff]   ;;  %s504_s20 = sshll.u32 %s979_s26, 4  ;;  %s520_s5 = sshll.u32 %s808_s15, 8 }
  0x4a   : > { %535 = vmatpush3.bf16.msra.mxu0 %v643_v1  ;;  %v648_v6 = vld [vmem:[#allocation5 + $0x10] sm:$0xff]   ;;  %v649_v7 = vld [vmem:[#allocation5 + $0x8] sm:$0xff]   ;;  %v650_v8 = vld [vmem:[#allocation5] sm:$0xff]   ;;  %s243_s22 = scalar_lea.vmem [#allocation8], %s504_s20  ;;  %s1001_s9 = scalar_lea.hbm %s1052_s3, %s520_s5 }
  0x4b   : > { %536 = vmatprep.subr.bf16.mxu0 %v823_v0  ;;  %v651_v9 = vld [vmem:[%s983_s6] sm:$0xff]   ;;  %v522_v10 = vld [vmem:[#allocation7] sm:$0xff]   ;;  %s383_s24 = sshll.u32 %s243_s22, 4  ;;  %s368_s21 = scalar_lea.sflag [#allocation4], %s979_s26  ;;  %s996_s24 = int_to_ptr.vmem [resolvable:$true] %s383_s24 }
  0x4c   : > { %v523_v11 = vunpack.c.l.bf16 %v522_v10  ;;  %v524_v14 = vunpack.c.h.bf16 %v522_v10  ;;  %s732_s10 = scalar_lea.vmem %s996_s24, 256  ;;  %s825_s15 = smov [#allocation8]  }
  0x4d   : > { %p733_p1 = scmp.ne.s32.totalorder %s996_s24, %s732_s10  ;;  %s736_s25 = sshll.u32 %s825_s15, 4  ;;  %s737_s25 = int_to_ptr.vmem [resolvable:$false] %s736_s25 }
  0x4e   : > { %537 = vmatpush3.bf16.msra.mxu0 %v644_v2  ;;  %s738_s18 = scalar_lea.vmem %s737_s25, 512  ;;  %p739_p8 = scmp.lt.s32.totalorder %s996_s24, %s737_s25 }
  0x4f   : > { %538 = vmatprep.subr.bf16.mxu0 %v823_v0  ;;  %p734_p4 = pnand %p733_p1, %p949_p3  ;;  %p740_p10 = scmp.lt.s32.totalorder %s738_s18, %s732_s10 }
  0x51   : > { %p735_p6 = pneg %p734_p4  ;;  %p741_p11 = por %p740_p10, %p739_p8 }
  0x52   : > { %539 = vmatpush3.bf16.msra.mxu0 %v645_v3 }
  0x53   : > { %540 = vmatprep.subr.bf16.mxu0 %v823_v0  ;;  %p742_p2 = pnand %p741_p11, %p735_p6 }
  0x56   : > { %541 = vmatpush3.bf16.msra.mxu0 %v646_v4 }
  0x57   : > { %542 = vmatprep.subr.bf16.mxu0 %v823_v0 }
  0x5a   : > { %543 = vmatpush3.bf16.msra.mxu0 %v647_v5 }
  0x5b   : > { %544 = vmatprep.subr.bf16.mxu0 %v823_v0 }
  0x5e   : > { %545 = vmatpush3.bf16.msra.mxu0 %v648_v6 }
  0x5f   : > { %546 = vmatprep.subr.bf16.mxu0 %v823_v0 }
  0x62   : > { %547 = vmatpush3.bf16.msra.mxu0 %v649_v7 }
  0x63   : > { %548 = vmatprep.subr.bf16.mxu0 %v823_v0 }
  0x66   : > { %549 = vmatpush3.bf16.msra.mxu0 %v650_v8 }
  0x69   : > { %551 = vmatmul.mubr.bf16.vlgmr.msra.gmra.mxu0 %v651_v9 }
 0x129   : > { %v358_v12 = vpop.f32.mrf.mxu0 }
 0x12a   : > { %v359_v13 = vadd.f32 %v523_v11, %v358_v12 }
 0x12b   : > { %v552_v15 = vpop.f32.mrf.mxu0 }
 0x12c   : > { %365 = vst [vmem:[%s243_s22] sm:$0xff] %v359_v13 }
 0x12d   : > { %v361_v16 = vpop.f32.mrf.mxu0 }
 0x12e   : > { %v362_v17 = vadd.f32 %v524_v14, %v361_v16 }
 0x12f   : > { %v553_v18 = vpop.f32.mrf.mxu0 }
 0x130   : > { %366 = vst [vmem:[%s243_s22 + $0x8] sm:$0xff] %v362_v17 }
 0x131   : > { %745 = shalt.err (!%p742_p2)
}
 0x132   : > { %s746_s28 = scalar_lea.hbm %s1001_s9, 256  ;;  %s750_s30 = scalar_lea.hbm %s1052_s3, 512 }
 0x133   : > { %p747_p9 = scmp.ne.s32.totalorder %s1001_s9, %s746_s28  ;;  %p751_p0 = scmp.lt.s32.totalorder %s1001_s9, %s1052_s3 }
 0x134   : > { %p752_p7 = scmp.lt.s32.totalorder %s750_s30, %s746_s28 }
 0x135   : > { %p748_p12 = pnand %p747_p9, %p949_p3 }
 0x136   : > { %p753_p5 = por %p752_p7, %p751_p0 }
 0x137   : > { %p749_p13 = pneg %p748_p12 }
 0x139   : > { %p754_p1 = pnand %p753_p5, %p749_p13 }
 0x13b   : > { %757 = shalt.err (!%p754_p1)
}
 0x13c   : > { %s826_s22 = smov 128   ;;  %s827_s5 = smov 8  }
 0x13d   : > { %564 = dma.vmem_to_hbm [thread:$0]  (%p949_p3), %s996_s24, 256, %s1001_s9, %s368_s21, %s826_s22, %s826_s22, %s827_s5  }
 0x13e PF: > { %s398_s7 = sand.u32 1, %s796_s12   ;;  %p1063_p4 = scmp.ne.s32.totalorder %s1057_s23, 0 }
 0x13f   : > { %p1064_p6 = scmp.ge.s32.totalorder %s816_s17, 2  ;;  %s399_s8 = scalar_lea.sflag [#allocation4], %s398_s7 }
 0x141   : > { %p578_p8 = pnand %p1064_p6, %p1063_p4 }
 0x143   : > { %p579_p10 = pneg %p578_p8 }
 0x145   : > { %791 = dma.done.wait (%p579_p10), %s399_s8, 256  }
 0x146   : > { %793 = vsyncadd (%p579_p10), %s399_s8, 4294967040  ;;  %s20_s17 = sadd.s32 1, %s816_s17   ;;  %s1065_s12 = smov %s800_s13 }
 0x147   : > { %p17_p11 = scmp.ge.s32.totalorder %s20_s17, 4   ;;  %s1066_s13 = smov %s804_s14 }
 0x148   : > { %s1067_s14 = smov %s958_s29  ;;  %s1068_s15 = smov %s812_s16 }
 0x149   : > { %s1069_s16 = smov %s1071_s11  ;;  %19 = sbr.rel (!%p17_p11) target bundleno = 7 (0x7), region = 86 }
 0x14e   :  { %404 = vsyncpa [#allocation3], 1 }
 0x14f   :  { %406 = vsyncpa [#allocation3 + $0x1], 1 }
 0x150   :  { %407 = vsyncpa [#allocation6], 1 }
 0x151   :  { %408 = vsyncpa [#allocation4], 1 }
 0x152   :  { %410 = vsyncpa [#allocation4 + $0x1], 1 }

// kernel: tpu_custom_call.1
= control target key start
LH: loop header
LB: loop body
LE: loop exit
PB: predicated region body
PF: predicated region fallthrough
CT: control target
= control target key end

     0   :  { %8 = vsyncpa [#allocation3], 0  ;;  %s1049_s0 = inlined_call_operand.hbm [shape: bf16[2,16,128], index: 0, kind: input, shape index: {}]   ;;  %s1050_s1 = inlined_call_operand.hbm [shape: bf16[128,128], index: 1, kind: input, shape index: {}]   ;;  %s1051_s2 = inlined_call_operand.hbm [shape: bf16[16,128], index: 2, kind: input, shape index: {}]   ;;  %s1052_s3 = inlined_call_operand.hbm [shape: f32[2,16,128], index: 3, kind: output, shape index: {}]  }
   0x1   :  { %10 = vsyncpa [#allocation3 + $0x1], 0 }
   0x2   :  { %11 = vsyncpa [#allocation6], 0 }
   0x3   :  { %12 = vsyncpa [#allocation4], 0 }
   0x4   :  { %14 = vsyncpa [#allocation4 + $0x1], 0  ;;  %s848_s12 = smov 0   ;;  %s850_s13 = smov 0  }
   0x5   :  { %s852_s14 = smov 0   ;;  %s854_s15 = smov 0  }
   0x6   :  { %s856_s16 = smov 0   ;;  %s858_s17 = smov 0  }
   0x7 LB: > { %s491_s18 = sadd.s32 4294967295, %s816_s17   ;;  %s492_s19 = sadd.s32 4294967294, %s816_s17   ;;  %s816_s17 = sphi %s858_s17, %s20_s17   ;;  %s812_s16 = sphi %s856_s16, %s1069_s16   ;;  %s808_s15 = sphi %s854_s15, %s1068_s15   ;;  %s804_s14 = sphi %s852_s14, %s1067_s14   ;;  %s800_s13 = sphi %s850_s13, %s1066_s13   ;;  %s796_s12 = sphi %s848_s12, %s1065_s12  }
   0x8   : > { %p54_p0 = scmp.ne.s32.totalorder %s800_s13, %s796_s12  ;;  %p882_p1 = scmp.eq.s32.totalorder %s491_s18, 0 }
   0x9   : > { %p886_p2 = scmp.eq.s32.totalorder %s491_s18, 1  ;;  %p133_p3 = scmp.eq.s32.totalorder %s492_s19, 1 }
   0xa   : > { %p892_p4 = por %p882_p1, %p54_p0  ;;  %p493_p5 = scmp.ge.s32.totalorder %s816_s17, 1 }
   0xb   : > { %p897_p6 = por %p133_p3, %p54_p0  ;;  %p140_p7 = scmp.lt.s32.totalorder %s816_s17, 3 }
   0xc   : > { %s818_s25 = smov [#allocation5]   ;;  %s819_s28 = smov [#allocation7]  }
   0xd   : > { %s1057_s23 = scalar_select %p897_p6, 1, 0 }
   0xe   : > { %p902_p8 = pnand %p493_p5, %p140_p7  ;;  %s152_s26 = sshll.u32 %s818_s25, 4  ;;  %s153_s26 = int_to_ptr.vmem [resolvable:$true] %s152_s26 }
   0xf   : > { %s168_s29 = sshll.u32 %s819_s28, 4  ;;  %s663_s30 = scalar_lea.vmem %s153_s26, 1024  ;;  %s169_s29 = int_to_ptr.vmem [resolvable:$true] %s168_s29 }
  0x10   : > { %p566_p9 = pneg %p902_p8  ;;  %p664_p13 = scmp.ne.s32.totalorder %s153_s26, %s663_s30 }
  0x11   : > { %p671_p5 = scmp.lt.s32.totalorder %s153_s26, %s153_s26  ;;  %p672_p7 = scmp.lt.s32.totalorder %s663_s30, %s663_s30 }
  0x12   : > { %p911_p11 = pnand %p566_p9, %p882_p1 }
  0x13   : > { %p673_p10 = por %p672_p7, %p671_p5 }
  0x14   : > { %p654_p12 = pneg %p911_p11 }
  0x16   : > { %p666_p0 = pnand %p664_p13, %p654_p12 }
  0x18   : > { %p667_p3 = pneg %p666_p0 }
  0x1a   : > { %p674_p9 = pnand %p673_p10, %p667_p3 }
  0x1c   : > { %677 = shalt.err (!%p674_p9)
}
  0x1d   : > { %s1053_s4 = smov 64   ;;  %s821_s5 = smov 4  }
  0x1e   : > { %569 = dma.hbm_to_vmem [thread:$0]  (!%p911_p11), %s1050_s1, 1024, %s153_s26, [#allocation6], %s1053_s4, %s1053_s4, %s821_s5  }
  0x1f   : > { %s689_s8 = scalar_lea.vmem %s169_s29, 128  ;;  %p697_p10 = scmp.lt.s32.totalorder %s169_s29, %s169_s29 }
  0x20   : > { %p690_p13 = scmp.ne.s32.totalorder %s169_s29, %s689_s8  ;;  %p698_p3 = scmp.lt.s32.totalorder %s689_s8, %s689_s8 }
  0x22   : > { %p692_p0 = pnand %p690_p13, %p654_p12  ;;  %p699_p7 = por %p698_p3, %p697_p10 }
  0x24   : > { %p693_p5 = pneg %p692_p0 }
  0x26   : > { %p700_p9 = pnand %p699_p7, %p693_p5 }
  0x28   : > { %703 = shalt.err (!%p700_p9)
}
  0x29   : > { %572 = dma.hbm_to_vmem [thread:$0]  (!%p911_p11), %s1051_s2, 128, %s169_s29, [#allocation6], %s1053_s4, %s1053_s4, %s821_s5  }
  0x2a   : > { %s32_s11 = sadd.s32 1, %s812_s16  ;;  %s41_s18 = sadd.s32 1, %s804_s14 }
  0x2b   : > { %p34_p12 = scmp.ge.s32.totalorder %s32_s11, 2  ;;  %p48_p13 = scmp.ne.s32.totalorder %s804_s14, %s800_s13 }
  0x2c   : > { %p49_p0 = scmp.eq.s32.totalorder %s816_s17, 0  ;;  %p583_p5 = scmp.lt.s32.totalorder %s816_s17, 2 }
  0x2d   : > { %s1071_s11 = smov (%p34_p12, %s32_s11), 0  ;;  %p949_p3 = por %p886_p2, %p48_p13 }
  0x2e   : > { %p50_p10 = por %p49_p0, %p48_p13  ;;  %s36_s25 = ssub.s32 %s812_s16, %s1071_s11 }
  0x2f   : > { %s182_s26 = sand.u32 1, %s804_s14   ;;  %p39_p7 = scmp.eq.s32.totalorder %s36_s25, 0 }
  0x30   : > { %s497_s27 = sshll.u32 %s182_s26, 3  ;;  %s519_s28 = sshll.u32 %s812_s16, 7 }
  0x31   : > { %s958_s29 = scalar_select %p39_p7, %s804_s14, %s41_s18  }
  0x32   : > { %s194_s7 = scalar_lea.hbm %s1049_s0, %s519_s28  ;;  %s186_s8 = scalar_lea.vmem [#allocation2], %s497_s27 }
  0x33   : > { %s195_s9 = sshll.u32 %s186_s8, 4  ;;  %p965_p11 = pnand %p583_p5, %p50_p10  ;;  %s196_s9 = int_to_ptr.vmem [resolvable:$true] %s195_s9 }
  0x34   : > { %s183_s10 = scalar_lea.sflag [#allocation3], %s182_s26  ;;  %s717_s25 = scalar_lea.vmem %s196_s9, 128 }
  0x35   : > { %p706_p2 = pneg %p965_p11  ;;  %p718_p9 = scmp.ne.s32.totalorder %s196_s9, %s717_s25 }
  0x36   : > { %s822_s18 = smov [#allocation2]  }
  0x37   : > { %p720_p12 = pnand %p718_p9, %p706_p2  ;;  %s722_s4 = sshll.u32 %s822_s18, 4  ;;  %s723_s4 = int_to_ptr.vmem [resolvable:$false] %s722_s4 }
  0x38   : > { %s724_s28 = scalar_lea.vmem %s723_s4, 256  ;;  %p725_p0 = scmp.lt.s32.totalorder %s196_s9, %s723_s4 }
  0x39   : > { %p721_p13 = pneg %p720_p12  ;;  %p726_p7 = scmp.lt.s32.totalorder %s724_s28, %s717_s25 }
  0x3b   : > { %p727_p6 = por %p726_p7, %p725_p0 }
  0x3d   : > { %p728_p5 = pnand %p727_p6, %p721_p13 }
  0x3f   : > { %731 = shalt.err (!%p728_p5)
}
  0x40   : > { %s1062_s27 = smov 64   ;;  %207 = sbr.rel (%p902_p8) target bundleno = 318 (0x13e), region = 32 }
  0x41   : > { %576 = dma.hbm_to_vmem [thread:$0]  (!%p965_p11), %s194_s7, 128, %s196_s9, %s183_s10, %s1062_s27, %s1062_s27, %s821_s5  }
  0x42   : > { %s979_s26 = sand.u32 (!%p902_p8), 1, %s800_s13  }
  0x43   : > { %s501_s4 = sshll.u32 (!%p902_p8), %s979_s26, 3  ;;  %s210_s30 = scalar_lea.sflag (!%p902_p8), [#allocation3], %s979_s26 }
  0x44   : > { %s983_s6 = scalar_lea.vmem (!%p902_p8), [#allocation2], %s501_s4 }
  0x45   : > { %783 = dma.done.wait (%p892_p4), %s210_s30, 128  }
  0x46   : > { %785 = vsyncadd (%p892_p4), %s210_s30, 4294967168 }
  0x47   : > { %787 = dma.done.wait (%p882_p1), [#allocation6], 1152  }
  0x48   : > { %789 = vsyncadd (%p882_p1), [#allocation6], 4294966144  ;;  %v823_v0 = vmov 0.0   ;;  %vm824_vm0 = vmmov 0   ;;  %v643_v1 = vld [vmem:[#allocation5 + $0x38] sm:$0xff]   ;;  %v644_v2 = vld [vmem:[#allocation5 + $0x30] sm:$0xff]  }
  0x49   : > { %534 = vmatprep.subr.bf16.mxu0 %v823_v0  ;;  %550 = vmatprep.mubr.msk.bf16.mxu0 %vm824_vm0, %v823_v0  ;;  %v645_v3 = vld [vmem:[#allocation5 + $0x28] sm:$0xff]   ;;  %v646_v4 = vld [vmem:[#allocation5 + $0x20] sm:$0xff]   ;;  %v647_v5 = vld [vmem:[#allocation5 + $0x18] sm:$0xff]   ;;  %s504_s20 = sshll.u32 %s979_s26, 4  ;;  %s520_s5 = sshll.u32 %s808_s15, 8 }
  0x4a   : > { %535 = vmatpush3.bf16.msra.mxu0 %v643_v1  ;;  %v648_v6 = vld [vmem:[#allocation5 + $0x10] sm:$0xff]   ;;  %v649_v7 = vld [vmem:[#allocation5 + $0x8] sm:$0xff]   ;;  %v650_v8 = vld [vmem:[#allocation5] sm:$0xff]   ;;  %s243_s22 = scalar_lea.vmem [#allocation8], %s504_s20  ;;  %s1001_s9 = scalar_lea.hbm %s1052_s3, %s520_s5 }
  0x4b   : > { %536 = vmatprep.subr.bf16.mxu0 %v823_v0  ;;  %v651_v9 = vld [vmem:[%s983_s6] sm:$0xff]   ;;  %v522_v10 = vld [vmem:[#allocation7] sm:$0xff]   ;;  %s383_s24 = sshll.u32 %s243_s22, 4  ;;  %s368_s21 = scalar_lea.sflag [#allocation4], %s979_s26  ;;  %s996_s24 = int_to_ptr.vmem [resolvable:$true] %s383_s24 }
  0x4c   : > { %v523_v11 = vunpack.c.l.bf16 %v522_v10  ;;  %v524_v14 = vunpack.c.h.bf16 %v522_v10  ;;  %s732_s10 = scalar_lea.vmem %s996_s24, 256  ;;  %s825_s15 = smov [#allocation8]  }
  0x4d   : > { %p733_p1 = scmp.ne.s32.totalorder %s996_s24, %s732_s10  ;;  %s736_s25 = sshll.u32 %s825_s15, 4  ;;  %s737_s25 = int_to_ptr.vmem [resolvable:$false] %s736_s25 }
  0x4e   : > { %537 = vmatpush3.bf16.msra.mxu0 %v644_v2  ;;  %s738_s18 = scalar_lea.vmem %s737_s25, 512  ;;  %p739_p8 = scmp.lt.s32.totalorder %s996_s24, %s737_s25 }
  0x4f   : > { %538 = vmatprep.subr.bf16.mxu0 %v823_v0  ;;  %p734_p4 = pnand %p733_p1, %p949_p3  ;;  %p740_p10 = scmp.lt.s32.totalorder %s738_s18, %s732_s10 }
  0x51   : > { %p735_p6 = pneg %p734_p4  ;;  %p741_p11 = por %p740_p10, %p739_p8 }
  0x52   : > { %539 = vmatpush3.bf16.msra.mxu0 %v645_v3 }
  0x53   : > { %540 = vmatprep.subr.bf16.mxu0 %v823_v0  ;;  %p742_p2 = pnand %p741_p11, %p735_p6 }
  0x56   : > { %541 = vmatpush3.bf16.msra.mxu0 %v646_v4 }
  0x57   : > { %542 = vmatprep.subr.bf16.mxu0 %v823_v0 }
  0x5a   : > { %543 = vmatpush3.bf16.msra.mxu0 %v647_v5 }
  0x5b   : > { %544 = vmatprep.subr.bf16.mxu0 %v823_v0 }
  0x5e   : > { %545 = vmatpush3.bf16.msra.mxu0 %v648_v6 }
  0x5f   : > { %546 = vmatprep.subr.bf16.mxu0 %v823_v0 }
  0x62   : > { %547 = vmatpush3.bf16.msra.mxu0 %v649_v7 }
  0x63   : > { %548 = vmatprep.subr.bf16.mxu0 %v823_v0 }
  0x66   : > { %549 = vmatpush3.bf16.msra.mxu0 %v650_v8 }
  0x69   : > { %551 = vmatmul.mubr.bf16.vlgmr.msra.gmra.mxu0 %v651_v9 }
 0x129   : > { %v358_v12 = vpop.f32.mrf.mxu0 }
 0x12a   : > { %v359_v13 = vadd.f32 %v523_v11, %v358_v12 }
 0x12b   : > { %v552_v15 = vpop.f32.mrf.mxu0 }
 0x12c   : > { %365 = vst [vmem:[%s243_s22] sm:$0xff] %v359_v13 }
 0x12d   : > { %v361_v16 = vpop.f32.mrf.mxu0 }
 0x12e   : > { %v362_v17 = vadd.f32 %v524_v14, %v361_v16 }
 0x12f   : > { %v553_v18 = vpop.f32.mrf.mxu0 }
 0x130   : > { %366 = vst [vmem:[%s243_s22 + $0x8] sm:$0xff] %v362_v17 }
 0x131   : > { %745 = shalt.err (!%p742_p2)
}
 0x132   : > { %s746_s28 = scalar_lea.hbm %s1001_s9, 256  ;;  %s750_s30 = scalar_lea.hbm %s1052_s3, 512 }
 0x133   : > { %p747_p9 = scmp.ne.s32.totalorder %s1001_s9, %s746_s28  ;;  %p751_p0 = scmp.lt.s32.totalorder %s1001_s9, %s1052_s3 }
 0x134   : > { %p752_p7 = scmp.lt.s32.totalorder %s750_s30, %s746_s28 }
 0x135   : > { %p748_p12 = pnand %p747_p9, %p949_p3 }
 0x136   : > { %p753_p5 = por %p752_p7, %p751_p0 }
 0x137   : > { %p749_p13 = pneg %p748_p12 }
 0x139   : > { %p754_p1 = pnand %p753_p5, %p749_p13 }
 0x13b   : > { %757 = shalt.err (!%p754_p1)
}
 0x13c   : > { %s826_s22 = smov 128   ;;  %s827_s5 = smov 8  }
 0x13d   : > { %564 = dma.vmem_to_hbm [thread:$0]  (%p949_p3), %s996_s24, 256, %s1001_s9, %s368_s21, %s826_s22, %s826_s22, %s827_s5  }
 0x13e PF: > { %s398_s7 = sand.u32 1, %s796_s12   ;;  %p1063_p4 = scmp.ne.s32.totalorder %s1057_s23, 0 }
 0x13f   : > { %p1064_p6 = scmp.ge.s32.totalorder %s816_s17, 2  ;;  %s399_s8 = scalar_lea.sflag [#allocation4], %s398_s7 }
 0x141   : > { %p578_p8 = pnand %p1064_p6, %p1063_p4 }
 0x143   : > { %p579_p10 = pneg %p578_p8 }
 0x145   : > { %791 = dma.done.wait (%p579_p10), %s399_s8, 256  }
 0x146   : > { %793 = vsyncadd (%p579_p10), %s399_s8, 4294967040  ;;  %s20_s17 = sadd.s32 1, %s816_s17   ;;  %s1065_s12 = smov %s800_s13 }
 0x147   : > { %p17_p11 = scmp.ge.s32.totalorder %s20_s17, 4   ;;  %s1066_s13 = smov %s804_s14 }
 0x148   : > { %s1067_s14 = smov %s958_s29  ;;  %s1068_s15 = smov %s812_s16 }
 0x149   : > { %s1069_s16 = smov %s1071_s11  ;;  %19 = sbr.rel (!%p17_p11) target bundleno = 7 (0x7), region = 86 }
 0x14e   :  { %404 = vsyncpa [#allocation3], 1 }
 0x14f   :  { %406 = vsyncpa [#allocation3 + $0x1], 1 }
 0x150   :  { %407 = vsyncpa [#allocation6], 1 }
 0x151   :  { %408 = vsyncpa [#allocation4], 1 }
 0x152   :  { %410 = vsyncpa [#allocation4 + $0x1], 1 }

</bundles_post_ra>
